<compile_context>
chip_gen: v7x
topology: tpu7x:2x2x1
jax: 0.10.0
libtpu: 0.0.40
codegen_flags: <defaults>
</compile_context>

<pallas_src>
import numpy as np
import jax
import jax.numpy as jnp
from jax import lax
from jax.experimental import pallas as pl
from jax.experimental.pallas import tpu as pltpu

NEG_FILL = -1e15  # matches torch masked_fill value -1000000000000000.0


# --------------------------------------------------------------------------------------
# Generation-aware VMEM budget / core count.
# --------------------------------------------------------------------------------------
def _tpu_config():
    kind = ""
    try:
        kind = jax.devices()[0].device_kind.lower()
    except Exception:
        pass
    if "v7" in kind:
        # v7x: 64 MiB physical VMEM / 32 MiB default scoped; 2 TensorCores per chip.
        # Keep the double-buffered working set ~20 MiB and cap the limit below scoped max.
        return dict(vmem_budget=20 << 20, vmem_limit=28 << 20, cores=2)
    # v5e / v6e: 128 MiB physical VMEM, 1 TensorCore per chip. v5e's default scoped VMEM
    # is only 16 MiB, so we must raise vmem_limit_bytes explicitly for bigger tiles.
    return dict(vmem_budget=40 << 20, vmem_limit=64 << 20, cores=1)


def _pick_batch_tile(batch, per_item_vmem_bytes, cfg, max_tile=256):
    """Largest batch tile that fits the per-generation VMEM budget."""
    cap = int(max(1, min(max_tile, cfg['vmem_budget'] // max(per_item_vmem_bytes, 1))))
    bt = min(batch, cap)
    if cfg['cores'] >= 2 and batch > 1:
        # v7x megacore only: keep >= 2 parallel grid steps so both TensorCores get work.
        bt = min(bt, -(-batch // 2))
    return max(1, int(bt))


def _pad_batch(x, padded_batch, fill=0.0):
    b = x.shape[0]
    if padded_batch == b:
        return x
    pad = jnp.full((padded_batch - b,) + x.shape[1:], fill, x.dtype)
    return jnp.concatenate([x, pad], axis=0)


# --------------------------------------------------------------------------------------
# Pallas kernel 1: ESIM local_inference (batched attention + enhancement)
#   bf16 I/O, f32 accumulation / softmax, merged additive masks, batch-tiled grid.
# --------------------------------------------------------------------------------------
def _local_inference_kernel(a_ref, b_ref, add_ref, s_ref, o_ref):
    a16 = a_ref[...]                     # (Bt, L, H) bf16
    b16 = b_ref[...]                     # (Bt, L, H) bf16
    add = add_ref[...]                   # (Bt, 2, L) f32: +1.0 valid / NEG_FILL padding
    add_a = add[:, 0:1, :]               # mask over a-positions (keys for b->a attention)
    add_b = add[:, 1:2, :]               # mask over b-positions (keys for a->b attention)

    a = a16.astype(jnp.float32)
    b = b16.astype(jnp.float32)

    # Batched scores on the MXU with f32 accumulation. e_ba is a second cheap matmul
    # (MXU is nearly idle at these shapes) rather than an XLU transpose of e_ab.
    e_ab = jnp.einsum('bqd,bkd->bqk', a16, b16, preferred_element_type=jnp.float32)
    e_ba = jnp.einsum('bkd,bqd->bkq', b16, a16, preferred_element_type=jnp.float32)

    def _softmax_last(x):
        m = jnp.max(x, axis=-1, keepdims=True)
        p = jnp.exp(x - m)
        return p * pl.reciprocal(jnp.sum(p, axis=-1, keepdims=True), approx=True)

    # Spans are guaranteed non-empty, so no fully-masked score row can occur (no 0/0 NaN).
    w_a = _softmax_last(e_ab + add_b)        # a attends over b keys
    w_b = _softmax_last(e_ba + add_a)        # b attends over a keys

    a_w = jnp.einsum('bqk,bkd->bqd', w_a.astype(jnp.bfloat16), b16,
                     preferred_element_type=jnp.float32)
    b_w = jnp.einsum('bkq,bqd->bkd', w_b.astype(jnp.bfloat16), a16,
                     preferred_element_type=jnp.float32)

    # Enhancement math in f32 (works on every generation), single bf16 cast at the store.
    # 4*H is a multiple of 128 (H = 32) -> each concat result is one lane-dense store.
    s_ref[...] = jnp.concatenate([a, a_w, a - a_w, a * a_w], axis=-1).astype(s_ref.dtype)
    o_ref[...] = jnp.concatenate([b, b_w, b - b_w, b * b_w], axis=-1).astype(o_ref.dtype)


def local_inference_pallas(a, b, mask_a, mask_b, batch_tile=None):
    B, L, H = a.shape
    cfg = _tpu_config()

    a16 = a.astype(jnp.bfloat16)
    b16 = b.astype(jnp.bfloat16)
    # Additive masks built once at trace time; valid positions carry the mask value (+1.0)
    # to match torch's `mask + masked_fill((1 - mask).bool(), NEG)` semantics exactly.
    add_a = jnp.where(mask_a > 0, mask_a.astype(jnp.float32), NEG_FILL)   # (B, L)
    add_b = jnp.where(mask_b > 0, mask_b.astype(jnp.float32), NEG_FILL)
    add = jnp.stack([add_a, add_b], axis=1)                               # (B, 2, L)

    # Per-batch-element VMEM: double-buffered bf16 ins/outs + merged mask + f32 score temps.
    per_item = (2 * (2 * L * H * 2 + 2 * L * 4 + 2 * L * 4 * H * 2)
                + 6 * L * L * 4)
    Bt = batch_tile if batch_tile is not None else _pick_batch_tile(B, per_item, cfg)
    Bp = pl.cdiv(B, Bt) * Bt

    a16 = _pad_batch(a16, Bp)
    b16 = _pad_batch(b16, Bp)
    add = _pad_batch(add, Bp, fill=1.0)   # padded rows: all keys "valid" -> finite, discarded

    out_shape = (jax.ShapeDtypeStruct((Bp, L, 4 * H), jnp.bfloat16),
                 jax.ShapeDtypeStruct((Bp, L, 4 * H), jnp.bfloat16))
    s_out, o_out = pl.pallas_call(
        _local_inference_kernel,
        out_shape=out_shape,
        grid=(Bp // Bt,),
        in_specs=[pl.BlockSpec((Bt, L, H), lambda i: (i, 0, 0)),
                  pl.BlockSpec((Bt, L, H), lambda i: (i, 0, 0)),
                  pl.BlockSpec((Bt, 2, L), lambda i: (i, 0, 0))],
        out_specs=(pl.BlockSpec((Bt, L, 4 * H), lambda i: (i, 0, 0)),
                   pl.BlockSpec((Bt, L, 4 * H), lambda i: (i, 0, 0))),
        compiler_params=pltpu.CompilerParams(
            dimension_semantics=("parallel",),
            vmem_limit_bytes=cfg['vmem_limit']),
    )(a16, b16, add)
    return s_out[:B], o_out[:B]


# --------------------------------------------------------------------------------------
# Pallas kernel 2: InferenceComposition head
#   masked avg/max pooling over seq -> concat -> (Linear + BatchNorm(eval) folded) ->
#   tanh -> exact softmax; batch-tiled, single packed parameter stream.
# --------------------------------------------------------------------------------------
def _composition_head_kernel(va_ref, vb_ref, m_ref, wb_ref, out_ref):
    va = va_ref[...].astype(jnp.float32)       # (Bt, L, H2)
    vb = vb_ref[...].astype(jnp.float32)
    m = m_ref[...]                             # (Bt, L, 2) in {0, 1}
    ma = m[:, :, 0:1]
    mb = m[:, :, 1:2]

    # Masked pooling over the statically padded sequence axis: padding never leaks into
    # the statistics and no data-dependent slicing / recompilation is needed.
    inv_len_a = pl.reciprocal(jnp.sum(ma, axis=1), approx=True)      # (Bt, 1)
    inv_len_b = pl.reciprocal(jnp.sum(mb, axis=1), approx=True)
    va_ave = jnp.sum(va * ma, axis=1) * inv_len_a                    # (Bt, H2)
    vb_ave = jnp.sum(vb * mb, axis=1) * inv_len_b
    va_max = jnp.max(jnp.where(ma > 0, va, NEG_FILL), axis=1)
    vb_max = jnp.max(jnp.where(mb > 0, vb, NEG_FILL), axis=1)
    v = jnp.concatenate([va_ave, va_max, vb_ave, vb_max], axis=-1)   # (Bt, 4*H2)

    # Single packed parameter block: rows [0:4*H2] = fused weight (Linear + BN folded),
    # last row = fused shift.  Dropout is identity in eval mode.
    wb = wb_ref[...]                           # (4*H2 + 1, T)
    y = jnp.tanh(jnp.dot(v, wb[:-1, :], preferred_element_type=jnp.float32) + wb[-1:, :])

    # final nn.Softmax(dim=1) -- exact division (T is tiny), per the correctness review.
    mx = jnp.max(y, axis=1, keepdims=True)
    p = jnp.exp(y - mx)
    out_ref[:, 0, :] = p / jnp.sum(p, axis=1, keepdims=True)


def composition_head_pallas(va, vb, mask_a, mask_b, w, b, gamma, beta, rm, rv,
                            batch_tile=None):
    B, L, H2 = va.shape
    T = w.shape[0]
    cfg = _tpu_config()

    va = va.astype(jnp.float32)
    vb = vb.astype(jnp.float32)
    masks = jnp.stack([mask_a.astype(jnp.float32), mask_b.astype(jnp.float32)],
                      axis=-1)                                        # (B, L, 2)

    # Fold Linear bias + BatchNorm1d (eval mode, running stats) into weight + shift:
    #   scale = gamma / sqrt(rv + eps)
    #   w_fused = W^T * scale ; shift = (b - rm) * scale + beta
    scale = jnp.asarray(gamma, jnp.float32) * lax.rsqrt(jnp.asarray(rv, jnp.float32) + 1e-5)
    w_fused = jnp.asarray(w, jnp.float32).T * scale[None, :]          # (4*H2, T)
    shift = (jnp.asarray(b, jnp.float32) - jnp.asarray(rm, jnp.float32)) * scale \
            + jnp.asarray(beta, jnp.float32)
    wb_packed = jnp.concatenate([w_fused, shift[None, :]], axis=0)    # (4*H2 + 1, T)

    per_item = 2 * (2 * L * H2 * 4 + L * 2 * 4 + T * 4)               # double-buffered io
    Bt = batch_tile if batch_tile is not None else _pick_batch_tile(B, per_item, cfg)
    Bp = pl.cdiv(B, Bt) * Bt

    va = _pad_batch(va, Bp)
    vb = _pad_batch(vb, Bp)
    masks = _pad_batch(masks, Bp, fill=1.0)   # padded rows stay finite, discarded after

    out = pl.pallas_call(
        _composition_head_kernel,
        out_shape=jax.ShapeDtypeStruct((Bp, 1, T), jnp.float32),
        grid=(Bp // Bt,),
        in_specs=[pl.BlockSpec((Bt, L, H2), lambda i: (i, 0, 0)),
                  pl.BlockSpec((Bt, L, H2), lambda i: (i, 0, 0)),
                  pl.BlockSpec((Bt, L, 2), lambda i: (i, 0, 0)),
                  pl.BlockSpec((4 * H2 + 1, T), lambda i: (0, 0))],
        out_specs=pl.BlockSpec((Bt, 1, T), lambda i: (i, 0, 0)),
        compiler_params=pltpu.CompilerParams(
            dimension_semantics=("parallel",),
            vmem_limit_bytes=cfg['vmem_limit']),
    )(va, vb, masks, wb_packed)
    return out.reshape(Bp, T)[:B]


# --------------------------------------------------------------------------------------
# Masked bidirectional LSTM reproducing pack_padded_sequence / pad_packed_sequence
# semantics (outputs at padded positions are zero; backward direction starts at each
# sequence's last valid token).
# TODO(synk): LSTM recurrence is inherently sequential -> implemented with lax.scan in
#             plain JAX rather than a Pallas kernel.
# --------------------------------------------------------------------------------------
def _lstm_scan(x, params):
    w_ih, w_hh, b_ih, b_hh = params
    B, L, _ = x.shape
    H = w_hh.shape[1]

    def step(carry, xt):
        h, c = carry
        gates = xt @ w_ih.T + b_ih + h @ w_hh.T + b_hh
        i, f, g, o = jnp.split(gates, 4, axis=-1)
        i = jax.nn.sigmoid(i)
        f = jax.nn.sigmoid(f)
        g = jnp.tanh(g)
        o = jax.nn.sigmoid(o)
        c = f * c + i * g
        h = o * jnp.tanh(c)
        return (h, c), h

    x_t = jnp.swapaxes(x, 0, 1)
    init = (jnp.zeros((B, H), x.dtype), jnp.zeros((B, H), x.dtype))
    _, hs = lax.scan(step, init, x_t)
    return jnp.swapaxes(hs, 0, 1)           # (B, L, H)


def bilstm_packed(x, mask, lengths, layer_params):
    """x: (B, L, D), mask: (B, L) float, lengths: (B,) int."""
    x = x.astype(jnp.float32)               # bf16-safe entry (scan carries stay f32)
    B, L, _ = x.shape
    lengths = jnp.asarray(lengths, jnp.int32)
    rev_idx = jnp.clip(lengths[:, None] - 1 - jnp.arange(L)[None, :], 0, L - 1)  # (B, L)
    h_in = x
    for layer in layer_params:
        h_fwd = _lstm_scan(h_in, layer['fwd'])
        x_rev = jnp.take_along_axis(h_in, rev_idx[:, :, None], axis=1)
        h_rev = _lstm_scan(x_rev, layer['bwd'])
        h_bwd = jnp.take_along_axis(h_rev, rev_idx[:, :, None], axis=1)
        h_in = jnp.concatenate([h_fwd, h_bwd], axis=-1) * mask[:, :, None]
    return h_in


def init_bilstm_params(key, input_dim, hidden_dim, num_layers):
    hid = hidden_dim // 2
    bound = 1.0 / np.sqrt(hid)
    params = []
    in_dim = input_dim
    for _ in range(num_layers):
        layer = {}
        for direction in ('fwd', 'bwd'):
            key, k1, k2, k3, k4 = jax.random.split(key, 5)
            layer[direction] = (
                jax.random.uniform(k1, (4 * hid, in_dim), jnp.float32, -bound, bound),
                jax.random.uniform(k2, (4 * hid, hid), jnp.float32, -bound, bound),
                jax.random.uniform(k3, (4 * hid,), jnp.float32, -bound, bound),
                jax.random.uniform(k4, (4 * hid,), jnp.float32, -bound, bound),
            )
        params.append(layer)
        in_dim = hidden_dim
    return params, key


# --------------------------------------------------------------------------------------
# InputEncoding: get_so_embedded equivalent.  Indices / masks are built on host from the
# Python so_pairs list (exactly mirroring the torch loop), the gather runs on device.
# `pad_to` gives a static common span length so downstream Pallas kernels compile once.
# --------------------------------------------------------------------------------------
def build_span_gather(so_pairs, pad_to=None):
    B = len(so_pairs)
    s_lens = [sp[0][1] - sp[0][0] + 1 for sp in so_pairs]
    o_lens = [sp[1][1] - sp[1][0] + 1 for sp in so_pairs]
    Lc = max(max(s_lens), max(o_lens))
    if pad_to is not None:
        assert pad_to >= Lc
        Lc = pad_to
    s_idx = np.zeros((B, Lc), np.int32)
    o_idx = np.zeros((B, Lc), np.int32)
    s_mask = np.zeros((B, Lc), np.float32)
    o_mask = np.zeros((B, Lc), np.float32)
    for i, sp in enumerate(so_pairs):
        s_idx[i, :s_lens[i]] = np.arange(sp[0][0], sp[0][1] + 1)
        o_idx[i, :o_lens[i]] = np.arange(sp[1][0], sp[1][1] + 1)
        s_mask[i, :s_lens[i]] = 1.0
        o_mask[i, :o_lens[i]] = 1.0
    return (s_idx, o_idx, s_mask, o_mask,
            np.asarray(s_lens, np.int32), np.asarray(o_lens, np.int32))


# --------------------------------------------------------------------------------------
# InputEncoding forward (the spec module): Bert -> span gather -> packed BiLSTM ->
# zero-padded encodings at a common length, plus the span masks.
# --------------------------------------------------------------------------------------
def input_encoding_forward(params, cfg, inputs):
    # TODO(synk): pretrained BertModel has no in-script equivalent; replaced by a
    #             deterministic embedding-table lookup producing text_embedded.
    text_embedded = params['bert_embedding'][inputs['sentence_tokens']]   # (B, T, E)

    s_idx, o_idx, s_mask_np, o_mask_np, s_len, o_len = build_span_gather(
        inputs['so_pairs'], pad_to=cfg.get('max_span_len'))
    s_idx = jnp.asarray(s_idx)
    o_idx = jnp.asarray(o_idx)
    s_masks = jnp.asarray(s_mask_np)
    o_masks = jnp.asarray(o_mask_np)

    s_emb = jnp.take_along_axis(text_embedded, s_idx[:, :, None], axis=1) * s_masks[:, :, None]
    o_emb = jnp.take_along_axis(text_embedded, o_idx[:, :, None], axis=1) * o_masks[:, :, None]

    s_enc = bilstm_packed(s_emb, s_masks, s_len, params['lstm1'])   # (B, Lc, H1)
    o_enc = bilstm_packed(o_emb, o_masks, o_len, params['lstm1'])
    # (the torch pad-to-common-length step is a no-op: both already have length Lc and
    #  positions past each span's length are zero, matching pad_packed + torch.cat pad)
    return dict(s_encoded=s_enc, o_encoded=o_enc, s_masks=s_masks, o_masks=o_masks,
                s_lengths=s_len, o_lengths=o_len)


# --------------------------------------------------------------------------------------
# Downstream ESIM tail exercising the two Pallas kernels.
# --------------------------------------------------------------------------------------
def esim_tail(params, enc):
    s_li, o_li = local_inference_pallas(enc['s_encoded'], enc['o_encoded'],
                                        enc['s_masks'], enc['o_masks'])     # (B, Lc, 4*H1)
    va = bilstm_packed(s_li, enc['s_masks'], enc['s_lengths'], params['lstm2'])
    vb = bilstm_packed(o_li, enc['o_masks'], enc['o_lengths'], params['lstm2'])
    return composition_head_pallas(
        va, vb, enc['s_masks'], enc['o_masks'],
        params['linear1_w'], params['linear1_b'],
        params['bn_gamma'], params['bn_beta'], params['bn_mean'], params['bn_var'])


# --------------------------------------------------------------------------------------
if __name__ == "__main__":
    cfg = dict(
        vocab_size=100,
        embedding_dim=32,
        lstm1_hidden_dim=32,
        lstm1_layer_num=1,
        lstm2_hidden_dim=32,
        lstm2_layer_num=1,
        num_tags=8,
        dropout=0.0,
        max_span_len=8,     # static span padding -> both Pallas kernels compile once
    )

    key = jax.random.PRNGKey(0)

    # ---- deterministic parameter init ----
    key, k_emb = jax.random.split(key)
    bert_embedding = 0.02 * jax.random.normal(
        k_emb, (cfg['vocab_size'], cfg['embedding_dim']), jnp.float32)

    lstm1_params, key = init_bilstm_params(
        key, cfg['embedding_dim'], cfg['lstm1_hidden_dim'], cfg['lstm1_layer_num'])
    lstm2_params, key = init_bilstm_params(
        key, 4 * cfg['lstm1_hidden_dim'], cfg['lstm2_hidden_dim'], cfg['lstm2_layer_num'])

    fan_in = 4 * cfg['lstm2_hidden_dim']
    bound = 1.0 / np.sqrt(fan_in)
    key, kw, kb = jax.random.split(key, 3)
    linear1_w = jax.random.uniform(kw, (cfg['num_tags'], fan_in), jnp.float32, -bound, bound)
    linear1_b = jax.random.uniform(kb, (cfg['num_tags'],), jnp.float32, -bound, bound)

    params = dict(
        bert_embedding=bert_embedding,
        lstm1=lstm1_params,
        lstm2=lstm2_params,
        linear1_w=linear1_w,
        linear1_b=linear1_b,
        bn_gamma=jnp.ones((cfg['num_tags'],), jnp.float32),
        bn_beta=jnp.zeros((cfg['num_tags'],), jnp.float32),
        bn_mean=jnp.zeros((cfg['num_tags'],), jnp.float32),
        bn_var=jnp.ones((cfg['num_tags'],), jnp.float32),
    )

    # ---- deterministic example inputs ----
    B, T_sent = 2, 16
    key, k_tok = jax.random.split(key)
    sentence_tokens = jax.random.randint(k_tok, (B, T_sent), 0, cfg['vocab_size'])
    sentence_masks = jnp.ones((B, T_sent), jnp.float32)
    # so_pairs: per example [(s_start, s_end), (o_start, o_end)], inclusive -> max span = 8
    so_pairs = [[(1, 8), (9, 12)],
                [(2, 6), (7, 13)]]

    inputs = dict(sentence_tokens=sentence_tokens,
                  sentence_masks=sentence_masks,
                  so_pairs=so_pairs)

    # ---- InputEncoding forward (spec module) ----
    enc = input_encoding_forward(params, cfg, inputs)
    jax.block_until_ready(enc['s_encoded'])
    Lc = cfg['max_span_len']
    assert enc['s_encoded'].shape == (B, Lc, cfg['lstm1_hidden_dim'])
    assert enc['o_encoded'].shape == (B, Lc, cfg['lstm1_hidden_dim'])
    assert enc['s_masks'].shape == (B, Lc) and enc['o_masks'].shape == (B, Lc)

    # ---- downstream ESIM tail (the two Pallas kernels) ----
    y_hat = esim_tail(params, enc)
    y_hat = jax.block_until_ready(y_hat)
    y_np = np.asarray(y_hat)
    assert y_np.shape == (B, cfg['num_tags'])
    assert np.isfinite(y_np).all()
    # exact-division final softmax -> rows sum to 1 up to f32 rounding
    assert np.allclose(y_np.sum(axis=1), 1.0, atol=1e-4)
    print("KERNEL_OK")
</pallas_src>

<mosaic_0001>
module attributes {stable_mosaic.version = 11 : i64} {
  func.func @_local_inference_kernel(%arg0: i32, %arg1: memref<2x8x32xbf16, #tpu.memory_space<vmem>>, %arg2: memref<2x8x32xbf16, #tpu.memory_space<vmem>>, %arg3: memref<2x2x8xf32, #tpu.memory_space<vmem>>, %arg4: memref<2x8x128xbf16, #tpu.memory_space<vmem>>, %arg5: memref<2x8x128xbf16, #tpu.memory_space<vmem>>) attributes {dimension_semantics = [#tpu.dimension_semantics<parallel>], iteration_bounds = array<i64: 1>, scalar_prefetch = 0 : i64, scratch_operands = 0 : i64, tpu.core_type = #tpu.core_type<tc>, window_params = [{transform_indices = @transform_0, window_bounds = array<i64: 2, 8, 32>}, {transform_indices = @transform_1, window_bounds = array<i64: 2, 8, 32>}, {transform_indices = @transform_2, window_bounds = array<i64: 2, 2, 8>}, {transform_indices = @transform_3, window_bounds = array<i64: 2, 8, 128>}, {transform_indices = @transform_4, window_bounds = array<i64: 2, 8, 128>}]} {
    %c0 = arith.constant 0 : index
    %c0_0 = arith.constant 0 : index
    %c0_1 = arith.constant 0 : index
    %0 = vector.load %arg1[%c0, %c0_0, %c0_1] : memref<2x8x32xbf16, #tpu.memory_space<vmem>>, vector<2x8x32xbf16>
    %c0_2 = arith.constant 0 : index
    %c0_3 = arith.constant 0 : index
    %c0_4 = arith.constant 0 : index
    %1 = vector.load %arg2[%c0_2, %c0_3, %c0_4] : memref<2x8x32xbf16, #tpu.memory_space<vmem>>, vector<2x8x32xbf16>
    %c0_5 = arith.constant 0 : index
    %c0_6 = arith.constant 0 : index
    %c0_7 = arith.constant 0 : index
    %2 = vector.load %arg3[%c0_5, %c0_6, %c0_7] : memref<2x2x8xf32, #tpu.memory_space<vmem>>, vector<2x2x8xf32>
    %3 = vector.extract_strided_slice %2 {offsets = [0, 0, 0], sizes = [2, 1, 8], strides = [1, 1, 1]} : vector<2x2x8xf32> to vector<2x1x8xf32>
    %4 = vector.extract_strided_slice %2 {offsets = [0, 1, 0], sizes = [2, 1, 8], strides = [1, 1, 1]} : vector<2x2x8xf32> to vector<2x1x8xf32>
    %5 = arith.extf %0 : vector<2x8x32xbf16> to vector<2x8x32xf32>
    %6 = arith.extf %1 : vector<2x8x32xbf16> to vector<2x8x32xf32>
    "tpu.trace_start"() <{level = 10 : i32, message = "bqd,bkd->bqk"}> : () -> ()
    %cst = arith.constant dense<0.000000e+00> : vector<2x8x8xf32>
    %7 = tpu.matmul %0, %1, %cst {dimension_numbers = #tpu.dot_dimension_numbers<[2], [2], [1], [1], [0, 0, 0, 1, 1, 1], [0], [0]>} : vector<2x8x32xbf16>, vector<2x8x32xbf16>, vector<2x8x8xf32> -> vector<2x8x8xf32>
    "tpu.trace_stop"() : () -> ()
    "tpu.trace_start"() <{level = 10 : i32, message = "bkd,bqd->bkq"}> : () -> ()
    %cst_8 = arith.constant dense<0.000000e+00> : vector<2x8x8xf32>
    %8 = tpu.matmul %1, %0, %cst_8 {dimension_numbers = #tpu.dot_dimension_numbers<[2], [2], [1], [1], [0, 0, 0, 1, 1, 1], [0], [0]>} : vector<2x8x32xbf16>, vector<2x8x32xbf16>, vector<2x8x8xf32> -> vector<2x8x8xf32>
    "tpu.trace_stop"() : () -> ()
    %9 = vector.broadcast %4 : vector<2x1x8xf32> to vector<2x8x8xf32>
    %10 = arith.addf %7, %9 : vector<2x8x8xf32>
    %cst_9 = arith.constant dense<0xFF800000> : vector<2x8xf32>
    %11 = vector.multi_reduction <maximumf>, %10, %cst_9 [2] : vector<2x8x8xf32> to vector<2x8xf32>
    %12 = vector.shape_cast %11 : vector<2x8xf32> to vector<2x8x1xf32>
    %13 = vector.broadcast %12 : vector<2x8x1xf32> to vector<2x8x8xf32>
    %14 = arith.subf %10, %13 : vector<2x8x8xf32>
    %15 = math.exp %14 : vector<2x8x8xf32>
    %cst_10 = arith.constant dense<0.000000e+00> : vector<2x8xf32>
    %16 = vector.multi_reduction <add>, %15, %cst_10 [2] : vector<2x8x8xf32> to vector<2x8xf32>
    %17 = vector.shape_cast %16 : vector<2x8xf32> to vector<2x8x1xf32>
    %18 = tpu.reciprocal %17 {approx = true} : vector<2x8x1xf32> -> vector<2x8x1xf32>
    %19 = vector.broadcast %18 : vector<2x8x1xf32> to vector<2x8x8xf32>
    %20 = arith.mulf %15, %19 : vector<2x8x8xf32>
    %21 = vector.broadcast %3 : vector<2x1x8xf32> to vector<2x8x8xf32>
    %22 = arith.addf %8, %21 : vector<2x8x8xf32>
    %cst_11 = arith.constant dense<0xFF800000> : vector<2x8xf32>
    %23 = vector.multi_reduction <maximumf>, %22, %cst_11 [2] : vector<2x8x8xf32> to vector<2x8xf32>
    %24 = vector.shape_cast %23 : vector<2x8xf32> to vector<2x8x1xf32>
    %25 = vector.broadcast %24 : vector<2x8x1xf32> to vector<2x8x8xf32>
    %26 = arith.subf %22, %25 : vector<2x8x8xf32>
    %27 = math.exp %26 : vector<2x8x8xf32>
    %cst_12 = arith.constant dense<0.000000e+00> : vector<2x8xf32>
    %28 = vector.multi_reduction <add>, %27, %cst_12 [2] : vector<2x8x8xf32> to vector<2x8xf32>
    %29 = vector.shape_cast %28 : vector<2x8xf32> to vector<2x8x1xf32>
    %30 = tpu.reciprocal %29 {approx = true} : vector<2x8x1xf32> -> vector<2x8x1xf32>
    %31 = vector.broadcast %30 : vector<2x8x1xf32> to vector<2x8x8xf32>
    %32 = arith.mulf %27, %31 : vector<2x8x8xf32>
    %33 = arith.truncf %20 : vector<2x8x8xf32> to vector<2x8x8xbf16>
    "tpu.trace_start"() <{level = 10 : i32, message = "bqk,bkd->bqd"}> : () -> ()
    %cst_13 = arith.constant dense<0.000000e+00> : vector<2x8x32xf32>
    %34 = tpu.matmul %33, %1, %cst_13 {dimension_numbers = #tpu.dot_dimension_numbers<[2], [1], [1], [2], [0, 0, 0, 1, 1, 2], [0], [0]>} : vector<2x8x8xbf16>, vector<2x8x32xbf16>, vector<2x8x32xf32> -> vector<2x8x32xf32>
    "tpu.trace_stop"() : () -> ()
    %35 = arith.truncf %32 : vector<2x8x8xf32> to vector<2x8x8xbf16>
    "tpu.trace_start"() <{level = 10 : i32, message = "bkq,bqd->bkd"}> : () -> ()
    %cst_14 = arith.constant dense<0.000000e+00> : vector<2x8x32xf32>
    %36 = tpu.matmul %35, %0, %cst_14 {dimension_numbers = #tpu.dot_dimension_numbers<[2], [1], [1], [2], [0, 0, 0, 1, 1, 2], [0], [0]>} : vector<2x8x8xbf16>, vector<2x8x32xbf16>, vector<2x8x32xf32> -> vector<2x8x32xf32>
    "tpu.trace_stop"() : () -> ()
    %37 = arith.subf %5, %34 : vector<2x8x32xf32>
    %38 = arith.mulf %5, %34 : vector<2x8x32xf32>
    %39 = tpu.concatenate %5, %34, %37, %38 in 2 : vector<2x8x32xf32>, vector<2x8x32xf32>, vector<2x8x32xf32>, vector<2x8x32xf32> -> vector<2x8x128xf32>
    %40 = arith.truncf %39 : vector<2x8x128xf32> to vector<2x8x128xbf16>
    %c0_15 = arith.constant 0 : index
    %c0_16 = arith.constant 0 : index
    %c0_17 = arith.constant 0 : index
    %41 = vector.load %arg4[%c0_15, %c0_16, %c0_17] : memref<2x8x128xbf16, #tpu.memory_space<vmem>>, vector<2x8x128xbf16>
    tpu.vector_store %arg4[%c0_15, %c0_16, %c0_17], %40 {strides = array<i32>} : memref<2x8x128xbf16, #tpu.memory_space<vmem>>, vector<2x8x128xbf16>,
    %42 = arith.subf %6, %36 : vector<2x8x32xf32>
    %43 = arith.mulf %6, %36 : vector<2x8x32xf32>
    %44 = tpu.concatenate %6, %36, %42, %43 in 2 : vector<2x8x32xf32>, vector<2x8x32xf32>, vector<2x8x32xf32>, vector<2x8x32xf32> -> vector<2x8x128xf32>
    %45 = arith.truncf %44 : vector<2x8x128xf32> to vector<2x8x128xbf16>
    %c0_18 = arith.constant 0 : index
    %c0_19 = arith.constant 0 : index
    %c0_20 = arith.constant 0 : index
    %46 = vector.load %arg5[%c0_18, %c0_19, %c0_20] : memref<2x8x128xbf16, #tpu.memory_space<vmem>>, vector<2x8x128xbf16>
    tpu.vector_store %arg5[%c0_18, %c0_19, %c0_20], %45 {strides = array<i32>} : memref<2x8x128xbf16, #tpu.memory_space<vmem>>, vector<2x8x128xbf16>,
    return
  }
  func.func @transform_0(%arg0: i32) -> (i32, i32, i32) {
    %c0_i32 = arith.constant 0 : i32
    %c0_i32_0 = arith.constant 0 : i32
    %c0_i32_1 = arith.constant 0 : i32
    return %arg0, %c0_i32, %c0_i32_0 : i32, i32, i32
  }
  func.func @transform_1(%arg0: i32) -> (i32, i32, i32) {
    %c0_i32 = arith.constant 0 : i32
    %c0_i32_0 = arith.constant 0 : i32
    %c0_i32_1 = arith.constant 0 : i32
    return %arg0, %c0_i32, %c0_i32_0 : i32, i32, i32
  }
  func.func @transform_2(%arg0: i32) -> (i32, i32, i32) {
    %c0_i32 = arith.constant 0 : i32
    %c0_i32_0 = arith.constant 0 : i32
    %c0_i32_1 = arith.constant 0 : i32
    return %arg0, %c0_i32, %c0_i32_0 : i32, i32, i32
  }
  func.func @transform_3(%arg0: i32) -> (i32, i32, i32) {
    %c0_i32 = arith.constant 0 : i32
    %c0_i32_0 = arith.constant 0 : i32
    %c0_i32_1 = arith.constant 0 : i32
    return %arg0, %c0_i32, %c0_i32_0 : i32, i32, i32
  }
  func.func @transform_4(%arg0: i32) -> (i32, i32, i32) {
    %c0_i32 = arith.constant 0 : i32
    %c0_i32_0 = arith.constant 0 : i32
    %c0_i32_1 = arith.constant 0 : i32
    return %arg0, %c0_i32, %c0_i32_0 : i32, i32, i32
  }
}

</mosaic_0001>

<bundles_post_ra>
// kernel: tpu_custom_call.1
= control target key start
LH: loop header
LB: loop body
LE: loop exit
PB: predicated region body
PF: predicated region fallthrough
CT: control target
= control target key end

     0   :  { %10 = vsyncpa [#allocation3], 0  ;;  %s1070_s0 = inlined_call_operand.hbm [shape: bf16[2,8,32], index: 0, kind: input, shape index: {}]   ;;  %s1071_s1 = inlined_call_operand.hbm [shape: bf16[2,8,32], index: 1, kind: input, shape index: {}]   ;;  %s1072_s2 = inlined_call_operand.hbm [shape: f32[2,2,8], index: 2, kind: input, shape index: {}]   ;;  %s1073_s3 = inlined_call_operand.hbm [shape: bf16[2,8,128], index: 3, kind: output, shape index: {0}]   ;;  %s1074_s4 = inlined_call_operand.hbm [shape: bf16[2,8,128], index: 4, kind: output, shape index: {1}]  }
   0x1   :  { %11 = vsyncpa [#allocation6], 0 }
   0x2   :  { %12 = vsyncpa [#allocation4], 0 }
   0x3   :  { %13 = vsyncpa [#allocation10], 0  ;;  %s859_s15 = smov [#allocation5]   ;;  %s860_s17 = smov [#allocation2]  }
   0x4   :  { %s31_s16 = sshll.u32 %s859_s15, 4  ;;  %s19_s18 = sshll.u32 %s860_s17, 4  ;;  %s32_s16 = int_to_ptr.vmem [resolvable:$true] %s31_s16  ;;  %s896_s18 = int_to_ptr.vmem [resolvable:$true] %s19_s18 }
   0x5   :  { %s741_s21 = scalar_lea.hbm %s1071_s1, 128 }
   0x6   :  { %p742_p0 = scmp.ne.s32.totalorder %s1071_s1, %s741_s21  ;;  %p745_p1 = scmp.lt.u32.totalorder %s741_s21, %s1071_s1 }
   0x8   :  { %p747_p2 = pnand %p745_p1, %p742_p0 }
   0xa   :  { %750 = shalt.err (!%p747_p2)
}
   0xb   :  { %s751_s26 = scalar_lea.vmem %s32_s16, 128  ;;  %p756_p4 = scmp.lt.s32.totalorder %s32_s16, %s32_s16 }
   0xc   :  { %p752_p3 = scmp.ne.s32.totalorder %s32_s16, %s751_s26  ;;  %p757_p5 = scmp.lt.s32.totalorder %s751_s26, %s751_s26 }
   0xe   :  { %p758_p6 = por %p757_p5, %p756_p4 }
  0x10   :  { %p759_p7 = pnand %p758_p6, %p752_p3 }
  0x12   :  { %762 = shalt.err (!%p759_p7)
}
  0x13   :  { %s861_s27 = smov 64   ;;  %s862_s28 = smov 4  }
  0x14   :  { %37 = dma.hbm_to_vmem [thread:$0]  %s1071_s1, 128, %s32_s16, [#allocation6], %s861_s27, %s861_s27, %s862_s28  }
  0x15   :  { %s763_s7 = scalar_lea.hbm %s1070_s0, 128 }
  0x16   :  { %p764_p8 = scmp.ne.s32.totalorder %s1070_s0, %s763_s7  ;;  %p767_p9 = scmp.lt.u32.totalorder %s763_s7, %s1070_s0 }
  0x18   :  { %p769_p10 = pnand %p767_p9, %p764_p8 }
  0x1a   :  { %772 = shalt.err (!%p769_p10)
}
  0x1b   :  { %s773_s12 = scalar_lea.vmem %s896_s18, 128  ;;  %p778_p12 = scmp.lt.s32.totalorder %s896_s18, %s896_s18 }
  0x1c   :  { %p774_p11 = scmp.ne.s32.totalorder %s896_s18, %s773_s12  ;;  %p779_p13 = scmp.lt.s32.totalorder %s773_s12, %s773_s12 }
  0x1e   :  { %p780_p0 = por %p779_p13, %p778_p12 }
  0x20   :  { %p781_p1 = pnand %p780_p0, %p774_p11 }
  0x22   :  { %784 = shalt.err (!%p781_p1)
}
  0x23   :  { %25 = dma.hbm_to_vmem [thread:$0]  %s1070_s0, 128, %s896_s18, [#allocation3], %s861_s27, %s861_s27, %s862_s28  }
  0x24   :  { %s863_s14 = smov [#allocation7]   ;;  %s785_s19 = scalar_lea.hbm %s1072_s2, 64 }
  0x25   :  { %s43_s15 = sshll.u32 %s863_s14, 4  ;;  %p786_p2 = scmp.ne.s32.totalorder %s1072_s2, %s785_s19  ;;  %s44_s15 = int_to_ptr.vmem [resolvable:$true] %s43_s15 }
  0x26   :  { %p789_p3 = scmp.lt.u32.totalorder %s785_s19, %s1072_s2 }
  0x28   :  { %p791_p4 = pnand %p789_p3, %p786_p2 }
  0x2a   :  { %794 = shalt.err (!%p791_p4)
}
  0x2b   :  { %s795_s24 = scalar_lea.vmem %s44_s15, 64  ;;  %p800_p6 = scmp.lt.s32.totalorder %s44_s15, %s44_s15 }
  0x2c   :  { %p796_p5 = scmp.ne.s32.totalorder %s44_s15, %s795_s24  ;;  %p801_p7 = scmp.lt.s32.totalorder %s795_s24, %s795_s24 }
  0x2e   :  { %p802_p8 = por %p801_p7, %p800_p6 }
  0x30   :  { %p803_p9 = pnand %p802_p8, %p796_p5 }
  0x32   :  { %806 = shalt.err (!%p803_p9)
}
  0x33   :  { %s864_s0 = smov 32   ;;  %s865_s18 = smov 2  }
  0x34   :  { %49 = dma.hbm_to_vmem [thread:$0]  %s1072_s2, 64, %s44_s15, [#allocation6], %s864_s0, %s864_s0, %s865_s18  }
  0x35   :  { %851 = dma.done.wait [#allocation3], 128  }
  0x36   :  { %852 = vsyncadd [#allocation3], 4294967168 }
  0x37   :  { %853 = dma.done.wait [#allocation6], 192  }
  0x38   :  { %854 = vsyncadd [#allocation6], 4294967104  ;;  %v866_v0 = vmov 0.0   ;;  %vm867_vm0 = vmmov 0   ;;  %vm78_vm1 = vcmask 261120   ;;  %v70_v9 = vlaneseq  ;;  %s868_s2 = smov 96  }
  0x39   :  { %635 = vmatprep.subr.bf16.mxu0 %v866_v0  ;;  %641 = vmatprep.subr.bf16.mxu1 %v866_v0  ;;  %v953_v1 = vld [vmem:[#allocation5] sm:$0xf]  ;;  %v955_v2 = vld [vmem:[#allocation5 + $0x4] sm:$0xf]  ;;  %v963_v5 = vld [vmem:[#allocation2] sm:$0xf] }
  0x3a   :  { %637 = vmatprep.mubr.msk.bf16.mxu0 %vm867_vm0, %v866_v0  ;;  %643 = vmatprep.mubr.msk.bf16.mxu1 %vm867_vm0, %v866_v0  ;;  %v83_v3 = vsel %vm78_vm1, %v953_v1, 0  ;;  %v129_v4 = vsel %vm78_vm1, %v955_v2, 0  ;;  %v965_v6 = vld [vmem:[#allocation2 + $0x4] sm:$0xf]  ;;  %v80_v7 = vsel %vm78_vm1, %v963_v5, 0  ;;  %v71_v10 = vshrl.u32 %v70_v9, 7 }
  0x3b   :  { %636 = vmatpush3.bf16.xpose.msra.mxu0 %v83_v3  ;;  %642 = vmatpush3.bf16.xpose.msra.mxu1 %v129_v4  ;;  %v126_v8 = vsel %vm78_vm1, %v965_v6, 0  ;;  %v64_v12 = vld [vmem:[#allocation7] sm:$0x3]  ;;  %v65_v13 = vld [vmem:[#allocation7 + $0x2] sm:$0x3]  ;;  %vm171_vm2 = vcmask 64512  }
  0x3c   :  { %647 = vmatprep.subr.bf16.mxu0 %v866_v0  ;;  %653 = vmatprep.subr.bf16.mxu1 %v866_v0  ;;  %v72_v11 = vsub.s32 1, %v71_v10  ;;  %v196_v22 = vsub.s32 0, %v71_v10  ;;  %vm309_vm3 = vcmask 1043456   ;;  %vm519_vm4 = vcmask 523264   ;;  %s869_s29 = smov [#allocation8]  }
  0x3d   :  { %v310_v63 = vsel %vm309_vm3, %v953_v1, 0  ;;  %v355_v3 = vsel %vm309_vm3, %v955_v2, 0  ;;  %vm522_vm5 = vcmask 785408   ;;  %s572_s30 = sshll.u32 %s869_s29, 4  ;;  %s573_s30 = int_to_ptr.vmem [resolvable:$true] %s572_s30 }
  0x3e   :  { %v73_v14 = vrot.slane %v64_v12, %v72_v11  ;;  %v77_v15 = vrot.slane %v65_v13, %v72_v11  ;;  %v197_v29 = vrot.slane %v64_v12, %v196_v22  ;;  %v201_v30 = vrot.slane %v65_v13, %v196_v22  ;;  %s807_s5 = scalar_lea.vmem %s573_s30, 128  ;;  %p812_p11 = scmp.lt.s32.totalorder %s573_s30, %s573_s30 }
  0x3f   :  { %v402_v13 = vsel %vm309_vm3, %v963_v5, 0  ;;  %p808_p10 = scmp.ne.s32.totalorder %s573_s30, %s807_s5  ;;  %p813_p12 = scmp.lt.s32.totalorder %s807_s5, %s807_s5 }
  0x41   :  { %p814_p13 = por %p813_p12, %p812_p11 }
  0x42   :  { %638 = vmatmul.mubr.msk.bf16.vlgmr.msra.gmra.mrb[0].mxu0 %vm78_vm1, %v963_v5  ;;  %644 = vmatmul.mubr.msk.bf16.vlgmr.msra.gmra.mrb[0].mxu1 %vm78_vm1, %v965_v6 }
  0x43   :  { %648 = vmatpush3.bf16.xpose.msra.mxu0 %v80_v7  ;;  %654 = vmatpush3.bf16.xpose.msra.mxu1 %v126_v8  ;;  %p815_p0 = pnand %p814_p13, %p808_p10 }
  0x44   :  { %649 = vmatprep.mubr.msk.bf16.mxu0 %vm867_vm0, %v866_v0  ;;  %655 = vmatprep.mubr.msk.bf16.mxu1 %vm867_vm0, %v866_v0 }
  0x45   :  { %659 = vmatprep.subr.bf16.mxu0 %v866_v0  ;;  %665 = vmatprep.subr.bf16.mxu1 %v866_v0 }
  0x4a   :  { %650 = vmatmul.mubr.msk.bf16.vlgmr.msra.gmra.mrb[4].mxu0 %vm78_vm1, %v953_v1  ;;  %656 = vmatmul.mubr.msk.bf16.vlgmr.msra.gmra.mrb[4].mxu1 %vm78_vm1, %v955_v2 }
  0x4b   :  { %661 = vmatprep.mubr.msk.bf16.mxu0 %vm867_vm0, %v866_v0  ;;  %667 = vmatprep.mubr.msk.bf16.mxu1 %vm867_vm0, %v866_v0 }
  0x4c   :  { %660 = vmatpush3.bf16.msra.mxu0 %v310_v63  ;;  %666 = vmatpush3.bf16.msra.mxu1 %v355_v3 }
  0x4d   :  { %671 = vmatprep.subr.bf16.mxu0 %v866_v0  ;;  %677 = vmatprep.subr.bf16.mxu1 %v866_v0 }
 0x115   :  { %v119_v16 = vpop.f32.mrb[0].mxu0  ;;  %v165_v17 = vpop.f32.mrb[0].mxu1 }
 0x116   :  { %v120_v18 = vadd.f32 %v119_v16, %v73_v14  ;;  %v639_v19 = vpop.f32.mrb[1].mxu0  ;;  %v166_v20 = vadd.f32 %v165_v17, %v77_v15  ;;  %v645_v21 = vpop.f32.mrb[1].mxu1  ;;  %v447_v17 = vsel %vm309_vm3, %v965_v6, 0 }
 0x117   :  { %v122_v23 = vpop.f32.mrb[2].mxu0  ;;  %v168_v24 = vpop.f32.mrb[2].mxu1 }
 0x118   :  { %v640_v25 = vpop.f32.mrb[3].mxu0  ;;  %v172_v26 = vsel %vm171_vm2, %v120_v18, -inf  ;;  %v646_v27 = vpop.f32.mrb[3].mxu1  ;;  %v175_v28 = vsel %vm171_vm2, %v166_v20, -inf  ;;  %v66_v24 = vunpack.c.l.bf16 %v963_v5  ;;  %v1019_v5 = vunpack.c.l.bf16 %v953_v1 }
 0x119   :  { %173 = vmax.xlane.f32.xlu0 %v172_v26  ;;  %v67_v26 = vunpack.c.l.bf16 %v965_v6 }
 0x11d   :  { %176 = vmax.xlane.f32.xlu0 %v175_v28  ;;  %v236_v31 = vpop.f32.mrb[4].mxu0  ;;  %v276_v32 = vpop.f32.mrb[4].mxu1 }
 0x11e   :  { %v237_v33 = vadd.f32 %v236_v31, %v197_v29  ;;  %v651_v34 = vpop.f32.mrb[5].mxu0  ;;  %v277_v35 = vadd.f32 %v276_v32, %v201_v30  ;;  %v657_v36 = vpop.f32.mrb[5].mxu1 }
 0x11f   :  { %v239_v37 = vpop.f32.mrb[6].mxu0  ;;  %v279_v38 = vpop.f32.mrb[6].mxu1 }
 0x120   :  { %v652_v39 = vpop.f32.mrb[7].mxu0  ;;  %v282_v40 = vsel %vm171_vm2, %v237_v33, -inf  ;;  %v658_v41 = vpop.f32.mrb[7].mxu1  ;;  %v285_v42 = vsel %vm171_vm2, %v277_v35, -inf }
 0x121   :  { %283 = vmax.xlane.f32.xlu1 %v282_v40  ;;  %v69_v41 = vunpack.c.l.bf16 %v955_v2 }
 0x125   :  { %286 = vmax.xlane.f32.xlu1 %v285_v42 }
 0x1a6   :  { %v174_v43 = vpop.xlane.xlu0 %173 }
 0x1a7   :  { %v178_v44 = vsub.f32 %v120_v18, %v174_v43 }
 0x1a9   :  { %v180_v45 = vmul.f32 1.442695, %v178_v44 }
 0x1aa   :  { %v177_v46 = vpop.xlane.xlu0 %176 }
 0x1ab   :  { %725 = vpow2.f32 %v180_v45  ;;  %v179_v47 = vsub.f32 %v166_v20, %v177_v46 }
 0x1ad   :  { %v182_v48 = vmul.f32 1.442695, %v179_v47 }
 0x1ae   :  { %v284_v49 = vpop.xlane.xlu1 %283 }
 0x1af   :  { %727 = vpow2.f32 %v182_v48  ;;  %v288_v50 = vsub.f32 %v237_v33, %v284_v49 }
 0x1b1   :  { %v290_v51 = vmul.f32 1.442695, %v288_v50 }
 0x1b2   :  { %v287_v52 = vpop.xlane.xlu1 %286 }
 0x1b3   :  { %729 = vpow2.f32 %v290_v51  ;;  %v289_v53 = vsub.f32 %v277_v35, %v287_v52 }
 0x1b5   :  { %v726_v54 = vpop.eup %725  ;;  %v292_v55 = vmul.f32 1.442695, %v289_v53 }
 0x1b6   :  { %v184_v56 = vsel %vm171_vm2, %v726_v54, 0.0 }
 0x1b7   :  { %731 = vpow2.f32 %v292_v55  ;;  %185 = vadd.xlane.f32.xlu0 %v184_v56 }
 0x1b9   :  { %v728_v57 = vpop.eup %727 }
 0x1ba   :  { %v187_v58 = vsel %vm171_vm2, %v728_v57, 0.0 }
 0x1bb   :  { %188 = vadd.xlane.f32.xlu1 %v187_v58 }
 0x1bd   :  { %v730_v59 = vpop.eup %729 }
 0x1be   :  { %v294_v60 = vsel %vm171_vm2, %v730_v59, 0.0 }
 0x1bf   :  { %295 = vadd.xlane.f32.xlu0 %v294_v60 }
 0x1c1   :  { %v732_v61 = vpop.eup %731 }
 0x1c2   :  { %v297_v62 = vsel %vm171_vm2, %v732_v61, 0.0 }
 0x1c3   :  { %298 = vadd.xlane.f32.xlu1 %v297_v62 }
 0x244   :  { %v186_v4 = vpop.xlane.xlu0 %185 }
 0x245   :  { %733 = vrcp.f32 %v186_v4 }
 0x248   :  { %v189_v7 = vpop.xlane.xlu1 %188 }
 0x249   :  { %735 = vrcp.f32 %v189_v7 }
 0x24c   :  { %v296_v8 = vpop.xlane.xlu0 %295 }
 0x24d   :  { %737 = vrcp.f32 %v296_v8 }
 0x24f   :  { %v734_v9 = vpop.eup %733 }
 0x250   :  { %v192_v10 = vmul.f32 %v734_v9, %v726_v54  ;;  %v299_v11 = vpop.xlane.xlu1 %298 }
 0x251   :  { %739 = vrcp.f32 %v299_v11 }
 0x252   :  { %v304_v12 = vpack.c.bf16 %v192_v10, %v192_v10 }
 0x253   :  { %v736_v14 = vpop.eup %735 }
 0x254   :  { %v193_v15 = vmul.f32 %v736_v14, %v728_v57  ;;  %662 = vmatmul.mubr.msk.bf16.vlgmr.msra.gmra.mrb[8].mxu0 %vm171_vm2, %v304_v12 }
 0x255   :  { %672 = vmatpush3.bf16.msra.mxu0 %v402_v13  ;;  %673 = vmatprep.mubr.msk.bf16.mxu0 %vm867_vm0, %v866_v0 }
 0x256   :  { %v305_v16 = vpack.c.bf16 %v193_v15, %v193_v15 }
 0x257   :  { %v738_v18 = vpop.eup %737 }
 0x258   :  { %v302_v19 = vmul.f32 %v738_v18, %v730_v59  ;;  %668 = vmatmul.mubr.msk.bf16.vlgmr.msra.gmra.mrb[8].mxu1 %vm171_vm2, %v305_v16 }
 0x259   :  { %678 = vmatpush3.bf16.msra.mxu1 %v447_v17  ;;  %679 = vmatprep.mubr.msk.bf16.mxu1 %vm867_vm0, %v866_v0 }
 0x25a   :  { %v397_v20 = vpack.c.bf16 %v302_v19, %v302_v19 }
 0x25b   :  { %v740_v21 = vpop.eup %739 }
 0x25c   :  { %v303_v22 = vmul.f32 %v740_v21, %v732_v61  ;;  %674 = vmatmul.mubr.msk.bf16.vlgmr.msra.gmra.mrb[12].mxu0 %vm171_vm2, %v397_v20 }
 0x25e   :  { %v398_v23 = vpack.c.bf16 %v303_v22, %v303_v22 }
 0x260   :  { %680 = vmatmul.mubr.msk.bf16.vlgmr.msra.gmra.mrb[12].mxu1 %vm171_vm2, %v398_v23 }
 0x327   :  { %v346_v25 = vpop.f32.mrb[8].mxu0 }
 0x328   :  { %v663_v27 = vpop.f32.mrb[9].mxu0  ;;  %v491_v30 = vmul.f32 %v346_v25, %v66_v24  ;;  %v489_v34 = vsub.f32 %v66_v24, %v346_v25 }
 0x329   :  { %v349_v28 = vpop.f32.mrb[10].mxu0 }
 0x32a   :  { %v664_v29 = vpop.f32.mrb[11].mxu0 }
 0x32b   :  { %v391_v31 = vpop.f32.mrb[8].mxu1 }
 0x32c   :  { %v492_v32 = vmul.f32 %v391_v31, %v67_v26  ;;  %v669_v0 = vpop.f32.mrb[9].mxu1  ;;  %v695_v33 = vpack.i.bf16 %v391_v31, %v346_v25  ;;  %v490_v35 = vsub.f32 %v67_v26, %v391_v31 }
 0x32d   :  { %v394_v36 = vpop.f32.mrb[10].mxu1 }
 0x32e   :  { %v670_v37 = vpop.f32.mrb[11].mxu1  ;;  %696 = vrot.lane.b32.xlu0 %v695_v33, %s864_s0  ;;  %v700_v38 = vpack.i.bf16 %v490_v35, %v489_v34  ;;  %v715_v39 = vpack.i.bf16 %v492_v32, %v491_v30 }
 0x32f   :  { %v438_v6 = vpop.f32.mrb[12].mxu0 }
 0x330   :  { %v675_v40 = vpop.f32.mrb[13].mxu0  ;;  %701 = vrot.lane.b32.xlu1 %v700_v38, %s861_s27  ;;  %v531_v44 = vmul.f32 %v438_v6, %v1019_v5  ;;  %v529_v49 = vsub.f32 %v1019_v5, %v438_v6 }
 0x331   :  { %v441_v42 = vpop.f32.mrb[14].mxu0 }
 0x332   :  { %v676_v43 = vpop.f32.mrb[15].mxu0  ;;  %716 = vrot.lane.b32.xlu0 %v715_v39, %s868_s2 }
 0x333   :  { %v483_v45 = vpop.f32.mrb[12].mxu1 }
 0x334   :  { %v532_v46 = vmul.f32 %v483_v45, %v69_v41  ;;  %v681_v47 = vpop.f32.mrb[13].mxu1  ;;  %v705_v48 = vpack.i.bf16 %v483_v45, %v438_v6  ;;  %v530_v1 = vsub.f32 %v69_v41, %v483_v45 }
 0x335   :  { %v486_v50 = vpop.f32.mrb[14].mxu1 }
 0x336   :  { %v682_v51 = vpop.f32.mrb[15].mxu1  ;;  %706 = vrot.lane.b32.xlu1 %v705_v48, %s864_s0  ;;  %v710_v52 = vpack.i.bf16 %v530_v1, %v529_v49  ;;  %v720_v53 = vpack.i.bf16 %v532_v46, %v531_v44 }
 0x33a   :  { %711 = vrot.lane.b32.xlu1 %v710_v52, %s861_s27 }
 0x33e   :  { %721 = vrot.lane.b32.xlu1 %v720_v53, %s868_s2 }
 0x3a0   :  { %v697_v2 = vpop.permute.xlu0 %696 }
 0x3a1   :  { %v699_v54 = vunpack.i.h.bf16 %v697_v2  ;;  %v698_v55 = vunpack.i.l.bf16 %v697_v2 }
 0x3a2   :  { %v702_v56 = vpop.permute.xlu1 %701 }
 0x3a3   :  { %v518_v57 = vsel %vm78_vm1, %v67_v26, %v699_v54  ;;  %v517_v58 = vsel %vm78_vm1, %v66_v24, %v698_v55  ;;  %v704_v59 = vunpack.i.h.bf16 %v702_v56  ;;  %v703_v60 = vunpack.i.l.bf16 %v702_v56 }
 0x3a4   :  { %v717_v61 = vpop.permute.xlu0 %716 }
 0x3a5   :  { %v521_v62 = vsel %vm519_vm4, %v518_v57, %v704_v59  ;;  %v520_v63 = vsel %vm519_vm4, %v517_v58, %v703_v60  ;;  %v719_v3 = vunpack.i.h.bf16 %v717_v61  ;;  %v718_v4 = vunpack.i.l.bf16 %v717_v61 }
 0x3a7   :  { %v523_v7 = vsel %vm522_vm5, %v520_v63, %v718_v4  ;;  %v524_v8 = vsel %vm522_vm5, %v521_v62, %v719_v3 }
 0x3a8   :  { %v707_v9 = vpop.permute.xlu1 %706  ;;  %v612_v10 = vpack.c.bf16 %v524_v8, %v523_v7 }
 0x3aa   :  { %613 = vst [vmem:[#allocation8] sm:$0xff] %v612_v10  }
 0x3ab   :  { %818 = shalt.err (!%p815_p0)
}
 0x3ac   :  { %s819_s8 = scalar_lea.hbm %s1073_s3, 128 }
 0x3ad   :  { %p820_p1 = scmp.ne.s32.totalorder %s1073_s3, %s819_s8  ;;  %p823_p2 = scmp.lt.u32.totalorder %s819_s8, %s1073_s3 }
 0x3af   :  { %p825_p3 = pnand %p823_p2, %p820_p1 }
 0x3b1   :  { %828 = shalt.err (!%p825_p3)
}
 0x3b2   :  { %578 = dma.vmem_to_hbm [thread:$0]  %s573_s30, 128, %s1073_s3, [#allocation4], %s861_s27, %s861_s27, %s862_s28   ;;  %v712_v11 = vpop.permute.xlu1 %711  ;;  %v709_v12 = vunpack.i.h.bf16 %v707_v9  ;;  %v708_v13 = vunpack.i.l.bf16 %v707_v9 }
 0x3b3   :  { %v714_v14 = vunpack.i.h.bf16 %v712_v11  ;;  %v713_v15 = vunpack.i.l.bf16 %v712_v11  ;;  %s870_s14 = smov [#allocation9]  }
 0x3b4   :  { %v558_v17 = vsel %vm78_vm1, %v69_v41, %v709_v12  ;;  %v557_v18 = vsel %vm78_vm1, %v1019_v5, %v708_v13  ;;  %s584_s15 = sshll.u32 %s870_s14, 4  ;;  %s585_s15 = int_to_ptr.vmem [resolvable:$true] %s584_s15 }
 0x3b5   :  { %v559_v21 = vsel %vm519_vm4, %v557_v18, %v713_v15  ;;  %v560_v22 = vsel %vm519_vm4, %v558_v17, %v714_v14  ;;  %s829_s3 = scalar_lea.vmem %s585_s15, 128  ;;  %p834_p5 = scmp.lt.s32.totalorder %s585_s15, %s585_s15 }
 0x3b6   :  { %v722_v16 = vpop.permute.xlu1 %721  ;;  %p830_p4 = scmp.ne.s32.totalorder %s585_s15, %s829_s3  ;;  %p835_p6 = scmp.lt.s32.totalorder %s829_s3, %s829_s3 }
 0x3b7   :  { %v724_v19 = vunpack.i.h.bf16 %v722_v16  ;;  %v723_v20 = vunpack.i.l.bf16 %v722_v16 }
 0x3b8   :  { %p836_p7 = por %p835_p6, %p834_p5 }
 0x3b9   :  { %v561_v23 = vsel %vm522_vm5, %v559_v21, %v723_v20  ;;  %v562_v24 = vsel %vm522_vm5, %v560_v22, %v724_v19 }
 0x3ba   :  { %v617_v25 = vpack.c.bf16 %v562_v24, %v561_v23  ;;  %p837_p8 = pnand %p836_p7, %p830_p4 }
 0x3bc   :  { %618 = vst [vmem:[#allocation9] sm:$0xff] %v617_v25  }
 0x3bd   :  { %840 = shalt.err (!%p837_p8)
}
 0x3be   :  { %s841_s19 = scalar_lea.hbm %s1074_s4, 128 }
 0x3bf   :  { %p842_p9 = scmp.ne.s32.totalorder %s1074_s4, %s841_s19  ;;  %p845_p10 = scmp.lt.u32.totalorder %s841_s19, %s1074_s4 }
 0x3c1   :  { %p847_p11 = pnand %p845_p10, %p842_p9 }
 0x3c3   :  { %850 = shalt.err (!%p847_p11)
}
 0x3c4   :  { %590 = dma.vmem_to_hbm [thread:$0]  %s585_s15, 128, %s1074_s4, [#allocation10], %s861_s27, %s861_s27, %s862_s28  }
 0x3c5   :  { %855 = dma.done.wait [#allocation4], 128  }
 0x3c6   :  { %856 = vsyncadd [#allocation4], 4294967168 }
 0x3c7   :  { %857 = dma.done.wait [#allocation10], 128  }
 0x3c8   :  { %858 = vsyncadd [#allocation10], 4294967168 }
 0x3c9   :  { %597 = vsyncpa [#allocation3], 1 }
 0x3ca   :  { %598 = vsyncpa [#allocation6], 1 }
 0x3cb   :  { %599 = vsyncpa [#allocation4], 1 }
 0x3cc   :  { %600 = vsyncpa [#allocation10], 1 }

</bundles_post_ra>
